<compile_context>
chip_gen: v6e
topology: v6e:2x2x1
jax: 0.10.0
libtpu: 0.0.40
codegen_flags: <defaults>
</compile_context>

<pallas_src>
import functools

import jax
import jax.numpy as jnp
from jax import lax
from jax.experimental import pallas as pl
from jax.experimental.pallas import tpu as pltpu


def _round_up(x, m):
    return ((x + m - 1) // m) * m


def _pick_tb(b_pad):
    """Row tile: >=32 (bf16 sublane packing) and >=2 row blocks when possible."""
    for cand in (256, 128, 64, 32):
        if b_pad % cand == 0 and b_pad // cand >= 2:
            return cand
    return 32


def _pick_tc(b, d):
    if b > 1024:
        tc = 512
    elif b > 256:
        tc = 256
    else:
        tc = 128
    # VMEM budget for large D (v5e 16 MiB scoped default, v7x 64 MiB physical).
    if d >= 8192:
        tc = 128
    elif d >= 2048:
        tc = min(tc, 256)
    return tc


def _pairwise_dist_block(s_row, s_col, mag_r, mag_c):
    """dist block for a (TB,D) x (TC,D) pair of bf16 tiles; f32 math."""
    sim = lax.dot_general(
        s_row, s_col,
        dimension_numbers=(((1,), (1,)), ((), ())),   # contract dim 1 of both
        preferred_element_type=jnp.float32)           # (TB,TC) f32 on the MXU
    d2 = mag_r + mag_c - 2.0 * sim                    # (TB,1)+(1,TC) broadcast
    return jnp.sqrt(jnp.maximum(d2, 0.0))             # relu().sqrt()


def _nes_kernel(s_row_ref, s_col_ref, mag_r_ref, mag_c_ref,
                t_r_ref, t_c_ref, nes_ref, *, margin, valid_b):
    """Pass 1: nes[i] = sum_{k valid, label_k != label_i} exp(margin - dist)."""
    j = pl.program_id(1)
    tc = s_col_ref.shape[0]

    @pl.when(j == 0)
    def _():
        nes_ref[...] = jnp.zeros_like(nes_ref)

    dist = _pairwise_dist_block(s_row_ref[...], s_col_ref[...],
                                mag_r_ref[...], mag_c_ref[...])
    # Global column index; excludes padded columns.  Vector iota only.
    cid = lax.broadcasted_iota(jnp.int32, (1, tc), 1) + j * tc
    neg = jnp.logical_and(t_r_ref[...] != t_c_ref[...], cid < valid_b)
    contrib = jnp.where(neg, jnp.exp(margin - dist), 0.0)
    nes_ref[...] += jnp.sum(contrib, axis=1, keepdims=True)      # (TB, 1)


def _rowloss_kernel(bi_ref, bj_ref,
                    s_row_ref, s_col_ref, mag_r_ref, mag_c_ref,
                    t_r_ref, t_c_ref, nes_r_ref, nes_c_ref,
                    row_loss_ref, *, valid_b):
    """Pass 2 (upper-triangle blocks only):
       row_loss[i] = sum_{j>i valid, label_j==label_i}
                       relu(log(nes_i + nes_j) + dist_ij)^2
    """
    k = pl.program_id(0)
    bi = bi_ref[k]
    bj = bj_ref[k]
    tb = s_row_ref.shape[0]
    tc = s_col_ref.shape[0]

    # First upper-triangle column block of this row block -> init accumulator.
    @pl.when(bj == (bi * tb) // tc)
    def _():
        row_loss_ref[...] = jnp.zeros_like(row_loss_ref)

    dist = _pairwise_dist_block(s_row_ref[...], s_col_ref[...],
                                mag_r_ref[...], mag_c_ref[...])

    # Positive-pair mask: same label, strict upper triangle, valid column.
    # (cid > rid) & (cid < valid_b) also excludes padded rows automatically.
    rid = lax.broadcasted_iota(jnp.int32, (tb, 1), 0) + bi * tb
    cid = lax.broadcasted_iota(jnp.int32, (1, tc), 1) + bj * tc
    eq = t_r_ref[...] == t_c_ref[...]
    pos = jnp.logical_and(eq, jnp.logical_and(cid > rid, cid < valid_b))

    l_n = jnp.log(nes_r_ref[...] + nes_c_ref[...])    # (TB,1)+(1,TC) broadcast
    pair = jnp.maximum(l_n + dist, 0.0)
    pair = pair * pair
    row_loss_ref[...] += jnp.sum(jnp.where(pos, pair, 0.0), axis=1,
                                 keepdims=True)


def lifted_loss(score, target, margin):
    """score: (B, D) float, target: (B,) int labels, margin: python float."""
    B, D = score.shape
    margin = float(margin)

    # ---- tile selection & padding ----------------------------------------
    tc = _pick_tc(B, D)
    b_pad = _round_up(B, tc)
    tb = _pick_tb(b_pad)
    nbr = b_pad // tb
    nbc = b_pad // tc

    # ---- wrapper-side plumbing (free XLA work; kernels never transpose) ---
    s_bf = score.astype(jnp.bfloat16)
    t = target.astype(jnp.int32)
    if b_pad != B:
        s_bf = jnp.pad(s_bf, ((0, b_pad - B), (0, 0)))
        t_pad = jnp.pad(t, (0, b_pad - B))
    else:
        t_pad = t
    s_f32 = s_bf.astype(jnp.float32)
    mag = jnp.sum(s_f32 * s_f32, axis=1)
    mag_col = mag.reshape(b_pad, 1)
    mag_row = mag.reshape(1, b_pad)
    t_col = t_pad.reshape(b_pad, 1)
    t_row = t_pad.reshape(1, b_pad)

    vmem_limit = 48 * 1024 * 1024   # < v7x 64 MiB physical; lots of headroom.

    # ---- pass 1: nes per row (2-D grid, rows parallel, cols reduction) ----
    cost1 = pl.CostEstimate(
        flops=2 * b_pad * b_pad * D + 8 * b_pad * b_pad,
        transcendentals=2 * b_pad * b_pad,                       # sqrt + exp
        bytes_accessed=int((nbr + nbc) * b_pad * D * 2 + 16 * b_pad))

    nes = pl.pallas_call(
        functools.partial(_nes_kernel, margin=margin, valid_b=B),
        out_shape=jax.ShapeDtypeStruct((b_pad, 1), jnp.float32),
        grid=(nbr, nbc),
        in_specs=[
            pl.BlockSpec((tb, D), lambda i, j: (i, 0)),   # score rows (bf16)
            pl.BlockSpec((tc, D), lambda i, j: (j, 0)),   # score cols (bf16)
            pl.BlockSpec((tb, 1), lambda i, j: (i, 0)),   # mag, column
            pl.BlockSpec((1, tc), lambda i, j: (0, j)),   # mag, row
            pl.BlockSpec((tb, 1), lambda i, j: (i, 0)),   # target, column
            pl.BlockSpec((1, tc), lambda i, j: (0, j)),   # target, row
        ],
        out_specs=pl.BlockSpec((tb, 1), lambda i, j: (i, 0)),
        compiler_params=pltpu.CompilerParams(
            dimension_semantics=("parallel", "arbitrary"),
            vmem_limit_bytes=vmem_limit),
        cost_estimate=cost1,
    )(s_bf, s_bf, mag_col, mag_row, t_col, t_row)

    # ---- pass 2: 1-D grid over upper-triangle blocks only -----------------
    # Block (i, j) can contribute iff its max global col > its min global row.
    blocks = [(i, j) for i in range(nbr) for j in range(nbc)
              if (j + 1) * tc - 1 > i * tb]
    nb = len(blocks)
    bi_arr = jnp.asarray([b[0] for b in blocks], dtype=jnp.int32)
    bj_arr = jnp.asarray([b[1] for b in blocks], dtype=jnp.int32)

    nb_elem = nb * tb * tc
    cost2 = pl.CostEstimate(
        flops=2 * nb_elem * D + 12 * nb_elem,
        transcendentals=2 * nb_elem,                              # sqrt + log
        bytes_accessed=int(nb * (tb + tc) * D * 2
                           + nb * (tb + tc) * 12 + b_pad * 4))

    grid_spec2 = pltpu.PrefetchScalarGridSpec(
        num_scalar_prefetch=2,                 # bi_arr, bj_arr -> SMEM
        grid=(nb,),
        in_specs=[
            pl.BlockSpec((tb, D), lambda k, bi, bj: (bi[k], 0)),
            pl.BlockSpec((tc, D), lambda k, bi, bj: (bj[k], 0)),
            pl.BlockSpec((tb, 1), lambda k, bi, bj: (bi[k], 0)),
            pl.BlockSpec((1, tc), lambda k, bi, bj: (0, bj[k])),
            pl.BlockSpec((tb, 1), lambda k, bi, bj: (bi[k], 0)),
            pl.BlockSpec((1, tc), lambda k, bi, bj: (0, bj[k])),
            pl.BlockSpec((tb, 1), lambda k, bi, bj: (bi[k], 0)),   # nes, column
            pl.BlockSpec((1, tc), lambda k, bi, bj: (0, bj[k])),   # nes, row
        ],
        out_specs=pl.BlockSpec((tb, 1), lambda k, bi, bj: (bi[k], 0)),
    )

    row_loss = pl.pallas_call(
        functools.partial(_rowloss_kernel, valid_b=B),
        out_shape=jax.ShapeDtypeStruct((b_pad, 1), jnp.float32),
        grid_spec=grid_spec2,
        compiler_params=pltpu.CompilerParams(
            dimension_semantics=("arbitrary",),
            vmem_limit_bytes=vmem_limit),
        cost_estimate=cost2,
    )(bi_arr, bj_arr, s_bf, s_bf, mag_col, mag_row, t_col, t_row,
      nes, nes.reshape(1, b_pad))

    # Positive-pair count via exact symmetry on the *unpadded* labels.
    n_pos = (jnp.sum((t.reshape(B, 1) == t.reshape(1, B)).astype(jnp.float32))
             - float(B)) * 0.5
    # Guard against a batch with no positive pairs (would be NaN otherwise).
    return jnp.sum(row_loss) / (2.0 * jnp.maximum(n_pos, 1.0))


def _reference(score, target, margin):
    """Pure-JAX reference mirroring the PyTorch loops (for sanity check)."""
    B = score.shape[0]
    mag = jnp.sum(score ** 2, axis=1)
    sim = score @ score.T
    dist = jnp.sqrt(jnp.maximum(mag[None, :] + mag[:, None] - 2.0 * sim, 0.0))
    loss = 0.0
    counter = 0
    for i in range(B):
        for j in range(i + 1, B):
            if int(target[i]) == int(target[j]):
                neg_i = dist[i][target != target[i]]
                neg_j = dist[j][target != target[j]]
                l_n = jnp.log(jnp.sum(jnp.exp(margin - neg_i)) +
                              jnp.sum(jnp.exp(margin - neg_j)))
                l_p = dist[i, j]
                loss = loss + jnp.maximum(l_n + l_p, 0.0) ** 2
                counter += 1
    return loss / (2 * counter)


if __name__ == "__main__":
    key = jax.random.PRNGKey(0)
    B, D = 8, 32
    margin = 1.0

    score = jax.random.normal(key, (B, D), dtype=jnp.float32)
    # Deterministic labels with multiple positive pairs and negatives per label.
    target = jnp.array([0, 0, 1, 1, 2, 2, 0, 1], dtype=jnp.int32)

    out = lifted_loss(score, target, margin)
    jax.block_until_ready(out)

    # Reference evaluated on the same bf16-rounded embeddings the kernel uses.
    score_q = score.astype(jnp.bfloat16).astype(jnp.float32)
    ref = _reference(score_q, target, margin)
    assert jnp.allclose(out, ref, rtol=1e-3, atol=1e-5), (out, ref)

    print("KERNEL_OK")
</pallas_src>

<mosaic_0001>
module attributes {stable_mosaic.version = 11 : i64} {
  func.func @_nes_kernel(%arg0: i32, %arg1: i32, %arg2: memref<64x32xbf16, #tpu.memory_space<vmem>>, %arg3: memref<128x32xbf16, #tpu.memory_space<vmem>>, %arg4: memref<64x1xf32, #tpu.memory_space<vmem>>, %arg5: memref<1x128xf32, #tpu.memory_space<vmem>>, %arg6: memref<64x1xi32, #tpu.memory_space<vmem>>, %arg7: memref<1x128xi32, #tpu.memory_space<vmem>>, %arg8: memref<64x1xf32, #tpu.memory_space<vmem>>) attributes {dimension_semantics = [#tpu.dimension_semantics<parallel>, #tpu.dimension_semantics<arbitrary>], iteration_bounds = array<i64: 2, 1>, scalar_prefetch = 0 : i64, scratch_operands = 0 : i64, tpu.core_type = #tpu.core_type<tc>, window_params = [{transform_indices = @transform_0, window_bounds = array<i64: 64, 32>}, {transform_indices = @transform_1, window_bounds = array<i64: 128, 32>}, {transform_indices = @transform_2, window_bounds = array<i64: 64, 1>}, {transform_indices = @transform_3, window_bounds = array<i64: 1, 128>}, {transform_indices = @transform_4, window_bounds = array<i64: 64, 1>}, {transform_indices = @transform_5, window_bounds = array<i64: 1, 128>}, {transform_indices = @transform_6, window_bounds = array<i64: 64, 1>}]} {
    %c0_i32 = arith.constant 0 : i32
    %0 = arith.cmpi eq, %arg1, %c0_i32 : i32
    %1 = arith.extui %0 : i1 to i32
    %c0_i32_0 = arith.constant 0 : i32
    %2 = arith.cmpi ne, %1, %c0_i32_0 : i32
    scf.if %2 {
      %cst_21 = arith.constant 0.000000e+00 : f32
      %40 = vector.broadcast %cst_21 : f32 to vector<64x1xf32>
      %c0_22 = arith.constant 0 : index
      %c0_23 = arith.constant 0 : index
      %41 = vector.load %arg8[%c0_22, %c0_23] : memref<64x1xf32, #tpu.memory_space<vmem>>, vector<64x1xf32>
      tpu.vector_store %arg8[%c0_22, %c0_23], %40 {strides = array<i32>} : memref<64x1xf32, #tpu.memory_space<vmem>>, vector<64x1xf32>,
    } else {
    }
    %c0 = arith.constant 0 : index
    %c0_1 = arith.constant 0 : index
    %3 = vector.load %arg2[%c0, %c0_1] : memref<64x32xbf16, #tpu.memory_space<vmem>>, vector<64x32xbf16>
    %c0_2 = arith.constant 0 : index
    %c0_3 = arith.constant 0 : index
    %4 = vector.load %arg3[%c0_2, %c0_3] : memref<128x32xbf16, #tpu.memory_space<vmem>>, vector<128x32xbf16>
    %c0_4 = arith.constant 0 : index
    %c0_5 = arith.constant 0 : index
    %5 = vector.load %arg4[%c0_4, %c0_5] : memref<64x1xf32, #tpu.memory_space<vmem>>, vector<64x1xf32>
    %c0_6 = arith.constant 0 : index
    %c0_7 = arith.constant 0 : index
    %6 = vector.load %arg5[%c0_6, %c0_7] : memref<1x128xf32, #tpu.memory_space<vmem>>, vector<1x128xf32>
    %cst = arith.constant dense<0.000000e+00> : vector<64x128xf32>
    %7 = tpu.matmul %3, %4, %cst {dimension_numbers = #tpu.dot_dimension_numbers<[1], [1], [0], [0], [0, 0, 1, 0], [], []>} : vector<64x32xbf16>, vector<128x32xbf16>, vector<64x128xf32> -> vector<64x128xf32>
    %8 = vector.broadcast %5 : vector<64x1xf32> to vector<64x128xf32>
    %9 = vector.broadcast %6 : vector<1x128xf32> to vector<64x128xf32>
    %10 = arith.addf %8, %9 : vector<64x128xf32>
    %cst_8 = arith.constant 2.000000e+00 : f32
    %11 = vector.broadcast %cst_8 : f32 to vector<64x128xf32>
    %12 = arith.mulf %11, %7 : vector<64x128xf32>
    %13 = arith.subf %10, %12 : vector<64x128xf32>
    %cst_9 = arith.constant 0.000000e+00 : f32
    %14 = vector.broadcast %cst_9 : f32 to vector<64x128xf32>
    %15 = arith.maximumf %13, %14 : vector<64x128xf32>
    %16 = math.sqrt %15 : vector<64x128xf32>
    %17 = tpu.iota {dimensions = array<i32: 1>} : vector<1x128xi32>
    %c128_i32 = arith.constant 128 : i32
    %18 = arith.muli %arg1, %c128_i32 : i32
    %19 = vector.broadcast %18 : i32 to vector<1x128xi32>
    %20 = arith.addi %17, %19 : vector<1x128xi32>
    %c0_10 = arith.constant 0 : index
    %c0_11 = arith.constant 0 : index
    %21 = vector.load %arg6[%c0_10, %c0_11] : memref<64x1xi32, #tpu.memory_space<vmem>>, vector<64x1xi32>
    %c0_12 = arith.constant 0 : index
    %c0_13 = arith.constant 0 : index
    %22 = vector.load %arg7[%c0_12, %c0_13] : memref<1x128xi32, #tpu.memory_space<vmem>>, vector<1x128xi32>
    %23 = vector.broadcast %21 : vector<64x1xi32> to vector<64x128xi32>
    %24 = vector.broadcast %22 : vector<1x128xi32> to vector<64x128xi32>
    %25 = arith.cmpi ne, %23, %24 : vector<64x128xi32>
    %c8_i32 = arith.constant 8 : i32
    %26 = vector.broadcast %c8_i32 : i32 to vector<1x128xi32>
    %27 = arith.cmpi slt, %20, %26 : vector<1x128xi32>
    %28 = vector.broadcast %27 : vector<1x128xi1> to vector<64x128xi1>
    %29 = arith.andi %25, %28 : vector<64x128xi1>
    %cst_14 = arith.constant 1.000000e+00 : f32
    %30 = vector.broadcast %cst_14 : f32 to vector<64x128xf32>
    %31 = arith.subf %30, %16 : vector<64x128xf32>
    %32 = math.exp %31 : vector<64x128xf32>
    %cst_15 = arith.constant 0.000000e+00 : f32
    %33 = vector.broadcast %cst_15 : f32 to vector<64x128xf32>
    %34 = arith.select %29, %32, %33 : vector<64x128xi1>, vector<64x128xf32>
    %c0_16 = arith.constant 0 : index
    %c0_17 = arith.constant 0 : index
    %35 = vector.load %arg8[%c0_16, %c0_17] : memref<64x1xf32, #tpu.memory_space<vmem>>, vector<64x1xf32>
    %cst_18 = arith.constant dense<0.000000e+00> : vector<64xf32>
    %36 = vector.multi_reduction <add>, %34, %cst_18 [1] : vector<64x128xf32> to vector<64xf32>
    %37 = vector.shape_cast %36 : vector<64xf32> to vector<64x1xf32>
    %38 = arith.addf %35, %37 : vector<64x1xf32>
    %c0_19 = arith.constant 0 : index
    %c0_20 = arith.constant 0 : index
    %39 = vector.load %arg8[%c0_19, %c0_20] : memref<64x1xf32, #tpu.memory_space<vmem>>, vector<64x1xf32>
    tpu.vector_store %arg8[%c0_19, %c0_20], %38 {strides = array<i32>} : memref<64x1xf32, #tpu.memory_space<vmem>>, vector<64x1xf32>,
    return
  }
  func.func @transform_0(%arg0: i32, %arg1: i32) -> (i32, i32) {
    %c0_i32 = arith.constant 0 : i32
    %c0_i32_0 = arith.constant 0 : i32
    return %arg0, %c0_i32 : i32, i32
  }
  func.func @transform_1(%arg0: i32, %arg1: i32) -> (i32, i32) {
    %c0_i32 = arith.constant 0 : i32
    %c0_i32_0 = arith.constant 0 : i32
    return %arg1, %c0_i32 : i32, i32
  }
  func.func @transform_2(%arg0: i32, %arg1: i32) -> (i32, i32) {
    %c0_i32 = arith.constant 0 : i32
    %c0_i32_0 = arith.constant 0 : i32
    return %arg0, %c0_i32 : i32, i32
  }
  func.func @transform_3(%arg0: i32, %arg1: i32) -> (i32, i32) {
    %c0_i32 = arith.constant 0 : i32
    %c0_i32_0 = arith.constant 0 : i32
    return %c0_i32, %arg1 : i32, i32
  }
  func.func @transform_4(%arg0: i32, %arg1: i32) -> (i32, i32) {
    %c0_i32 = arith.constant 0 : i32
    %c0_i32_0 = arith.constant 0 : i32
    return %arg0, %c0_i32 : i32, i32
  }
  func.func @transform_5(%arg0: i32, %arg1: i32) -> (i32, i32) {
    %c0_i32 = arith.constant 0 : i32
    %c0_i32_0 = arith.constant 0 : i32
    return %c0_i32, %arg1 : i32, i32
  }
  func.func @transform_6(%arg0: i32, %arg1: i32) -> (i32, i32) {
    %c0_i32 = arith.constant 0 : i32
    %c0_i32_0 = arith.constant 0 : i32
    return %arg0, %c0_i32 : i32, i32
  }
}

</mosaic_0001>

<bundles_post_ra>
// kernel: tpu_custom_call.1
= control target key start
LH: loop header
LB: loop body
LE: loop exit
PB: predicated region body
PF: predicated region fallthrough
CT: control target
= control target key end

     0   :  { %s1203_s21 = smov 0   ;;  %s1205_s22 = smov 0   ;;  %s1436_s0 = inlined_call_operand.vmem [shape: bf16[128,32], index: 0, kind: input, shape index: {}]   ;;  %s1437_s1 = inlined_call_operand.vmem [shape: bf16[128,32], index: 1, kind: input, shape index: {}]   ;;  %s1438_s2 = inlined_call_operand.vmem [shape: f32[128,1], index: 2, kind: input, shape index: {}]   ;;  %s1439_s3 = inlined_call_operand.vmem [shape: f32[1,128], index: 3, kind: input, shape index: {}]   ;;  %s1440_s4 = inlined_call_operand.vmem [shape: s32[128,1], index: 4, kind: input, shape index: {}]   ;;  %s1441_s5 = inlined_call_operand.vmem [shape: s32[1,128], index: 5, kind: input, shape index: {}]   ;;  %s1442_s6 = inlined_call_operand.vmem [shape: f32[128,1], index: 6, kind: output, shape index: {}]  }
   0x1   :  { %s1207_s23 = smov 0  }
   0x2 LB: > { %s28_s24 = sadd.s32 1, %s1160_s22  ;;  %p973_p0 = scmp.ge.s32.totalorder %s1164_s23, 1  ;;  %s1164_s23 = sphi %s1207_s23, %s16_s23   ;;  %s1160_s22 = sphi %s1205_s22, %s1444_s22   ;;  %s1156_s21 = sphi %s1203_s21, %s1443_s21  }
   0x3   : > { %p30_p1 = scmp.ge.s32.totalorder %s28_s24, 2  ;;  %p274_p2 = scmp.lt.s32.totalorder %s1164_s23, 3 }
   0x5   : > { %s1446_s24 = smov (%p30_p1, %s28_s24), 0  ;;  %p275_p3 = pnand %p973_p0, %p274_p2 }
   0x6   : > { %s974_s29 = sshll.u32 (!%p275_p3), %s1156_s21, 3 }
   0x7   : > { %278 = sbr.rel (%p275_p3) target bundleno = 470 (0x1d6), region = 44  ;;  %p326_p4 = scmp.lt.s32.totalorder (!%p275_p3), %s974_s29, 15 }
   0xc   : > { %v1098_v0 = vld [vmem:[%s1437_s1 + $0x38] sm:$0xff]   ;;  %vm468_vm0 = vcmask 261120   ;;  %v1099_v1 = vld [vmem:[%s1437_s1 + $0x30] sm:$0xff]   ;;  %v1100_v4 = vld [vmem:[%s1437_s1 + $0x28] sm:$0xff]   ;;  %v1166_v5 = vmov 0   ;;  %s1448_s29 = smov (!%p326_p4, %s974_s29), 15 }
   0xd   : > { %1054 = vmatprep.subr.msk.bf16.mxu0 %vm468_vm0, %v1098_v0  ;;  %1055 = vmatprep.subr.msk.bf16.mxu1 %vm468_vm0, %v1098_v0  ;;  %v503_v2 = vsel %vm468_vm0, %v1098_v0, 0  ;;  %v500_v3 = vsel %vm468_vm0, %v1099_v1, 0  ;;  %s975_s8 = sshll.u32 %s1448_s29, 2  ;;  %s1238_s9 = sshll.u32 %s1448_s29, 3  ;;  %v497_v8 = vsel %vm468_vm0, %v1100_v4, 0  ;;  %v1101_v9 = vld [vmem:[%s1437_s1 + $0x20] sm:$0xff]  }
   0xe   : > { %1015 = vmatpush3.bf16.xpose.msra.mxu0 %v503_v2  ;;  %1046 = vmatpush3.bf16.xpose.msra.mxu1 %v503_v2  ;;  %s1243_s12 = scalar_lea.vmem %s1436_s0, %s975_s8  ;;  %s341_s15 = scalar_lea.vmem %s1438_s2, %s1238_s9  ;;  %v494_v14 = vsel %vm468_vm0, %v1101_v9, 0  ;;  %v1102_v15 = vld [vmem:[%s1437_s1 + $0x18] sm:$0xff]   ;;  %v1103_v21 = vld [vmem:[%s1437_s1 + $0x10] sm:$0xff]   ;;  %v1104_v27 = vld [vmem:[%s1437_s1 + $0x8] sm:$0xff]   ;;  %vm366_vm1 = vcmask 7168   ;;  %v1167_v37 = vmov 0.0  }
   0xf   : > { %1056 = vmatprep.subr.msk.bf16.mxu0 %vm468_vm0, %v1099_v1  ;;  %1057 = vmatprep.subr.msk.bf16.mxu1 %vm468_vm0, %v1099_v1  ;;  %v1106_v6 = vld [vmem:[%s1243_s12] sm:$0xff]   ;;  %v1107_v7 = vld [vmem:[%s1243_s12 + $0x10] sm:$0xff]   ;;  %v402_v12 = vld [vmem:[%s341_s15 + $0x18] sm:$0xff]  ;;  %s350_s25 = scalar_lea.vmem %s1440_s4, %s1238_s9  ;;  %v491_v20 = vsel %vm468_vm0, %v1102_v15, 0  ;;  %v488_v26 = vsel %vm468_vm0, %v1103_v21, 0  ;;  %v485_v32 = vsel %vm468_vm0, %v1104_v27, 0  ;;  %s1296_s11 = scalar_lea.vmem %s1442_s6, %s1238_s9 }
  0x10   : > { %1097 = vset.pattern.permute.xlu1 %v1166_v5  ;;  %1096 = vset.pattern.permute.xlu0 %v1166_v5  ;;  %v401_v10 = vld [vmem:[%s341_s15 + $0x10] sm:$0xff]  ;;  %v399_v11 = vld [vmem:[%s341_s15] sm:$0xff]  ;;  %v400_v13 = vld [vmem:[%s341_s15 + $0x8] sm:$0xff]  ;;  %369 = vst.msk [vmem:[%s1296_s11 + $0x10] sm:$0xff] %vm366_vm1, %v1167_v37 }
  0x11   : > { %1030 = vmatprep.mubr.msk.bf16.mxu0 %vm468_vm0, %v1106_v6  ;;  %1034 = vmatprep.mubr.msk.bf16.mxu1 %vm468_vm0, %v1107_v7  ;;  %v404_v16 = vld [vmem:[%s341_s15 + $0x28] sm:$0xff]  ;;  %v403_v17 = vld [vmem:[%s341_s15 + $0x20] sm:$0xff]  ;;  %v406_v18 = vld [vmem:[%s341_s15 + $0x38] sm:$0xff]  ;;  %367 = vst.msk [vmem:[%s1296_s11] sm:$0xff] %vm366_vm1, %v1167_v37 }
  0x12   : > { %582 = vperm.xlu1 %1097, %v401_v10   ;;  %572 = vperm.xlu0 %1096, %v399_v11   ;;  %v405_v19 = vld [vmem:[%s341_s15 + $0x30] sm:$0xff]  ;;  %v710_v22 = vld [vmem:[%s350_s25 + $0x8] sm:$0xff]  ;;  %v709_v23 = vld [vmem:[%s350_s25] sm:$0xff]  ;;  %368 = vst.msk [vmem:[%s1296_s11 + $0x8] sm:$0xff] %vm366_vm1, %v1167_v37 }
  0x13   : > { %v712_v24 = vld [vmem:[%s350_s25 + $0x18] sm:$0xff]  ;;  %v711_v25 = vld [vmem:[%s350_s25 + $0x10] sm:$0xff]  ;;  %v714_v28 = vld [vmem:[%s350_s25 + $0x28] sm:$0xff]  ;;  %370 = vst.msk [vmem:[%s1296_s11 + $0x18] sm:$0xff] %vm366_vm1, %v1167_v37 }
  0x14   : > { %v713_v29 = vld [vmem:[%s350_s25 + $0x20] sm:$0xff]  ;;  %v716_v30 = vld [vmem:[%s350_s25 + $0x38] sm:$0xff]  ;;  %v715_v31 = vld [vmem:[%s350_s25 + $0x30] sm:$0xff]  ;;  %371 = vst.msk [vmem:[%s1296_s11 + $0x20] sm:$0xff] %vm366_vm1, %v1167_v37 }
  0x15   : > { %v1105_v33 = vld [vmem:[%s1437_s1] sm:$0xff]   ;;  %v1108_v35 = vld [vmem:[%s1243_s12 + $0x8] sm:$0xff]   ;;  %v1109_v36 = vld [vmem:[%s1243_s12 + $0x18] sm:$0xff]   ;;  %372 = vst.msk [vmem:[%s1296_s11 + $0x28] sm:$0xff] %vm366_vm1, %v1167_v37 }
  0x16   : > { %1017 = vmatpush3.bf16.xpose.msra.mxu0 %v500_v3  ;;  %1047 = vmatpush3.bf16.xpose.msra.mxu1 %v500_v3  ;;  %v482_v34 = vsel %vm468_vm0, %v1105_v33, 0  ;;  %373 = vst.msk [vmem:[%s1296_s11 + $0x30] sm:$0xff] %vm366_vm1, %v1167_v37  ;;  %374 = vst.msk [vmem:[%s1296_s11 + $0x38] sm:$0xff] %vm366_vm1, %v1167_v37  ;;  %v998_v43 = vld [vmem:[%s1439_s3] ss:$0 sm:$0xff] }
  0x17   : > { %1058 = vmatprep.subr.msk.bf16.mxu0 %vm468_vm0, %v1100_v4  ;;  %1059 = vmatprep.subr.msk.bf16.mxu1 %vm468_vm0, %v1100_v4 }
  0x18   : > { %587 = vperm.xlu1 %1097, %v402_v12   ;;  %577 = vperm.xlu0 %1096, %v400_v13  }
  0x1c   : > { %597 = vperm.xlu1 %1097, %v404_v16   ;;  %592 = vperm.xlu0 %1096, %v403_v17  }
  0x1e   : > { %1019 = vmatpush3.bf16.xpose.msra.mxu0 %v497_v8  ;;  %1048 = vmatpush3.bf16.xpose.msra.mxu1 %v497_v8 }
  0x1f   : > { %1060 = vmatprep.subr.msk.bf16.mxu0 %vm468_vm0, %v1101_v9  ;;  %1061 = vmatprep.subr.msk.bf16.mxu1 %vm468_vm0, %v1101_v9 }
  0x20   : > { %607 = vperm.xlu1 %1097, %v406_v18   ;;  %602 = vperm.xlu0 %1096, %v405_v19  }
  0x24   : > { %722 = vperm.xlu1 %1097, %v710_v22   ;;  %719 = vperm.xlu0 %1096, %v709_v23   ;;  %v704_v23 = vlaneseq }
  0x26   : > { %1021 = vmatpush3.bf16.xpose.msra.mxu0 %v494_v14  ;;  %1049 = vmatpush3.bf16.xpose.msra.mxu1 %v494_v14 }
  0x27   : > { %1062 = vmatprep.subr.msk.bf16.mxu0 %vm468_vm0, %v1102_v15  ;;  %1063 = vmatprep.subr.msk.bf16.mxu1 %vm468_vm0, %v1102_v15 }
  0x28   : > { %728 = vperm.xlu1 %1097, %v712_v24   ;;  %725 = vperm.xlu0 %1096, %v711_v25  }
  0x2c   : > { %734 = vperm.xlu1 %1097, %v714_v28   ;;  %731 = vperm.xlu0 %1096, %v713_v29  }
  0x2e   : > { %1023 = vmatpush3.bf16.xpose.msra.mxu0 %v491_v20  ;;  %1050 = vmatpush3.bf16.xpose.msra.mxu1 %v491_v20 }
  0x2f   : > { %1064 = vmatprep.subr.msk.bf16.mxu0 %vm468_vm0, %v1103_v21  ;;  %1065 = vmatprep.subr.msk.bf16.mxu1 %vm468_vm0, %v1103_v21 }
  0x30   : > { %740 = vperm.xlu1 %1097, %v716_v30   ;;  %737 = vperm.xlu0 %1096, %v715_v31  }
  0x36   : > { %1025 = vmatpush3.bf16.xpose.msra.mxu0 %v488_v26  ;;  %1051 = vmatpush3.bf16.xpose.msra.mxu1 %v488_v26 }
  0x37   : > { %1066 = vmatprep.subr.msk.bf16.mxu0 %vm468_vm0, %v1104_v27  ;;  %1067 = vmatprep.subr.msk.bf16.mxu1 %vm468_vm0, %v1104_v27 }
  0x3e   : > { %1027 = vmatpush3.bf16.xpose.msra.mxu0 %v485_v32  ;;  %1052 = vmatpush3.bf16.xpose.msra.mxu1 %v485_v32 }
  0x3f   : > { %1068 = vmatprep.subr.msk.bf16.mxu0 %vm468_vm0, %v1105_v33  ;;  %1069 = vmatprep.subr.msk.bf16.mxu1 %vm468_vm0, %v1105_v33 }
  0x46   : > { %1029 = vmatpush3.bf16.xpose.msra.mxu0 %v482_v34  ;;  %1053 = vmatpush3.bf16.xpose.msra.mxu1 %v482_v34 }
  0x4d   : > { %1031 = vmatmul.mubr.msk.bf16.vlgmr.msra.gmra.mxu0 %vm468_vm0, %v1108_v35  ;;  %1035 = vmatmul.mubr.msk.bf16.vlgmr.msra.gmra.mxu1 %vm468_vm0, %v1109_v36 }
  0x8d   : > { %v573_v38 = vpop.permute.xlu0 %572  ;;  %v583_v40 = vpop.permute.xlu1 %582 }
  0x8e   : > { %v618_v45 = vadd.f32 %v998_v43, %v583_v40  ;;  %v616_v52 = vadd.f32 %v998_v43, %v573_v38 }
  0x93   : > { %v578_v39 = vpop.permute.xlu0 %577  ;;  %v588_v42 = vpop.permute.xlu1 %587 }
  0x94   : > { %v619_v60 = vadd.f32 %v998_v43, %v588_v42  ;;  %v617_v61 = vadd.f32 %v998_v43, %v578_v39 }
  0x97   : > { %v593_v41 = vpop.permute.xlu0 %592  ;;  %v598_v46 = vpop.permute.xlu1 %597 }
  0x98   : > { %v620_v53 = vadd.f32 %v998_v43, %v593_v41  ;;  %v621_v5 = vadd.f32 %v998_v43, %v598_v46 }
  0x9b   : > { %v603_v44 = vpop.permute.xlu0 %602  ;;  %v608_v0 = vpop.permute.xlu1 %607 }
  0x9c   : > { %v622_v47 = vadd.f32 %v998_v43, %v603_v44  ;;  %v623_v6 = vadd.f32 %v998_v43, %v608_v0 }
 0x10d   : > { %v1032_v48 = vpop.f32.mrf.mxu0  ;;  %v1036_v49 = vpop.f32.mrf.mxu1 }
 0x10e   : > { %v626_v50 = vmul.f32 2.0, %v1032_v48  ;;  %v630_v51 = vmul.f32 2.0, %v1036_v49 }
 0x10f   : > { %v539_v54 = vpop.f32.mrf.mxu0  ;;  %v555_v55 = vpop.f32.mrf.mxu1 }
 0x110   : > { %v634_v56 = vsub.f32 %v618_v45, %v626_v50  ;;  %v638_v57 = vsub.f32 %v622_v47, %v630_v51  ;;  %v624_v58 = vmul.f32 2.0, %v539_v54  ;;  %v628_v59 = vmul.f32 2.0, %v555_v55 }
 0x111   : > { %v1033_v62 = vpop.f32.mrf.mxu0  ;;  %v1037_v63 = vpop.f32.mrf.mxu1 }
 0x112   : > { %v642_v1 = vmax.f32 %v634_v56, 0.0  ;;  %v1317_v2 = vmax.f32 %v638_v57, 0.0  ;;  %v632_v3 = vsub.f32 %v616_v52, %v624_v58  ;;  %v636_v4 = vsub.f32 %v620_v53, %v628_v59 }
 0x113   : > { %v627_v7 = vmul.f32 2.0, %v1033_v62  ;;  %v631_v8 = vmul.f32 2.0, %v1037_v63  ;;  %v542_v9 = vpop.f32.mrf.mxu0  ;;  %v558_v10 = vpop.f32.mrf.mxu1 }
 0x114   : > { %1110 = vrsqrt.f32 %v642_v1  ;;  %v640_v11 = vmax.f32 %v632_v3, 0.0  ;;  %v1319_v12 = vmax.f32 %v636_v4, 0.0  ;;  %v625_v13 = vmul.f32 2.0, %v542_v9 }
 0x115   : > { %1112 = vrsqrt.f32 %v1317_v2  ;;  %v635_v14 = vsub.f32 %v619_v60, %v627_v7  ;;  %v639_v15 = vsub.f32 %v623_v6, %v631_v8  ;;  %v629_v16 = vmul.f32 2.0, %v558_v10  ;;  %v720_v60 = vpop.permute.xlu0 %719 }
 0x116   : > { %1114 = vrsqrt.f32 %v640_v11  ;;  %v633_v17 = vsub.f32 %v617_v61, %v625_v13  ;;  %vm664_vm2 = vcmp.eq.f32.partialorder %v642_v1, inf  ;;  %vm666_vm3 = vcmp.eq.f32.partialorder %v642_v1, 0.0 }
 0x117   : > { %1116 = vrsqrt.f32 %v1319_v12  ;;  %v1323_v18 = vmax.f32 %v635_v14, 0.0  ;;  %v1325_v19 = vmax.f32 %v639_v15, 0.0  ;;  %v637_v20 = vsub.f32 %v621_v5, %v629_v16 }
 0x118   : > { %v1327_v21 = vmax.f32 %v633_v17, 0.0  ;;  %v667_v24 = vand.u32 2147483648, %v642_v1  ;;  %vm678_vm4 = vcmp.eq.f32.partialorder %v1319_v12, inf  ;;  %vm680_vm5 = vcmp.eq.f32.partialorder %v1319_v12, 0.0 }
 0x119   : > { %1118 = vrsqrt.f32 %v1323_v18  ;;  %v1330_v22 = vmax.f32 %v637_v20, 0.0  ;;  %v681_v25 = vand.u32 2147483648, %v1319_v12  ;;  %vm650_vm6 = vcmp.eq.f32.partialorder %v640_v11, inf  ;;  %v726_v15 = vpop.permute.xlu0 %725  ;;  %v999_v20 = vld [vmem:[%s1441_s5] ss:$0 sm:$0xff] }
 0x11a   : > { %1120 = vrsqrt.f32 %v1325_v19  ;;  %vm652_vm7 = vcmp.eq.f32.partialorder %v640_v11, 0.0  ;;  %v653_v27 = vand.u32 2147483648, %v640_v11  ;;  %v660_v28 = vand.u32 2147483648, %v1327_v21 }
 0x11b   : > { %1122 = vrsqrt.f32 %v1327_v21  ;;  %vm657_vm8 = vcmp.eq.f32.partialorder %v1327_v21, inf  ;;  %vm671_vm9 = vcmp.eq.f32.partialorder %v1323_v18, inf  ;;  %vm673_vm10 = vcmp.eq.f32.partialorder %v1323_v18, 0.0 }
 0x11c   : > { %1124 = vrsqrt.f32 %v1330_v22  ;;  %v674_v31 = vand.u32 2147483648, %v1323_v18  ;;  %vm659_vm11 = vcmp.eq.f32.partialorder %v1327_v21, 0.0  ;;  %vm692_vm12 = vcmp.eq.f32.partialorder %v1317_v2, inf }
 0x11d   : > { %vm694_vm13 = vcmp.eq.f32.partialorder %v1317_v2, 0.0  ;;  %v695_v34 = vand.u32 2147483648, %v1317_v2  ;;  %vm685_vm14 = vcmp.eq.f32.partialorder %v1330_v22, inf  ;;  %vm687_vm15 = vcmp.eq.f32.partialorder %v1330_v22, 0.0 }
 0x11e   : > { %v688_v41 = vand.u32 2147483648, %v1330_v22  ;;  %vm699_vm0 = vcmp.eq.f32.partialorder %v1325_v19, inf  ;;  %v702_v59 = vand.u32 2147483648, %v1325_v19  ;;  %v705_v16 = vand.u32 127, %v704_v23 }
 0x121   : > { %v1111_v26 = vpop.eup %1110 }
 0x122   : > { %v1113_v29 = vpop.eup %1112  ;;  %v663_v30 = vmul.f32 %v1111_v26, %v642_v1 }
 0x123   : > { %v1115_v32 = vpop.eup %1114  ;;  %v691_v33 = vmul.f32 %v1113_v29, %v1317_v2 }
 0x124   : > { %v1117_v35 = vpop.eup %1116  ;;  %v649_v36 = vmul.f32 %v1115_v32, %v640_v11  ;;  %v665_v37 = vsel %vm664_vm2, %v642_v1, %v663_v30  ;;  %vm701_vm2 = vcmp.eq.f32.partialorder %v1325_v19, 0.0 }
 0x125   : > { %v677_v38 = vmul.f32 %v1117_v35, %v1319_v12  ;;  %v668_v39 = vsel %vm666_vm3, %v667_v24, %v665_v37  ;;  %v693_v40 = vsel %vm692_vm12, %v1317_v2, %v691_v33  ;;  %vm748_vm3 = vcmp.ne.s32.totalorder %v726_v15, %v999_v20 }
 0x126   : > { %v1119_v42 = vpop.eup %1118  ;;  %v767_v43 = vsub.f32 1.0, %v668_v39  ;;  %v651_v44 = vsel %vm650_vm6, %v640_v11, %v649_v36  ;;  %v696_v49 = vsel %vm694_vm13, %v695_v34, %v693_v40 }
 0x127   : > { %v1121_v45 = vpop.eup %1120  ;;  %v670_v46 = vmul.f32 %v1119_v42, %v1323_v18  ;;  %v679_v47 = vsel %vm678_vm4, %v1319_v12, %v677_v38  ;;  %v654_v48 = vsel %vm652_vm7, %v653_v27, %v651_v44  ;;  %v771_v3 = vsub.f32 1.0, %v696_v49  ;;  %v723_v12 = vpop.permute.xlu1 %722  ;;  %v799_v42 = vld [vmem:[%s1296_s11 + $0x10] sm:$0xff] }
 0x128   : > { %v1123_v50 = vpop.eup %1122  ;;  %v698_v51 = vmul.f32 %v1121_v45, %v1325_v19  ;;  %v777_v52 = vmul.f32 1.442695, %v767_v43  ;;  %v682_v53 = vsel %vm680_vm5, %v681_v25, %v679_v47  ;;  %v765_v54 = vsub.f32 1.0, %v654_v48  ;;  %v801_v45 = vld [vmem:[%s1296_s11 + $0x20] sm:$0xff] }
 0x129   : > { %v1125_v55 = vpop.eup %1124  ;;  %v656_v56 = vmul.f32 %v1123_v50, %v1327_v21  ;;  %v769_v57 = vsub.f32 1.0, %v682_v53  ;;  %v672_v58 = vsel %vm671_vm9, %v1323_v18, %v670_v46  ;;  %v785_v14 = vmul.f32 1.442695, %v771_v3  ;;  %v797_v46 = vld [vmem:[%s1296_s11] sm:$0xff] }
 0x12a   : > { %v684_v61 = vmul.f32 %v1125_v55, %v1330_v22  ;;  %1126 = vpow2.f32 %v777_v52  ;;  %v773_v62 = vmul.f32 1.442695, %v765_v54  ;;  %v675_v63 = vsel %vm673_vm10, %v674_v31, %v672_v58  ;;  %v800_v52 = vld [vmem:[%s1296_s11 + $0x18] sm:$0xff]  ;;  %v802_v58 = vld [vmem:[%s1296_s11 + $0x28] sm:$0xff] }
 0x12b   : > { %v781_v0 = vmul.f32 1.442695, %v769_v57  ;;  %v658_v1 = vsel %vm657_vm8, %v1327_v21, %v656_v56  ;;  %v768_v2 = vsub.f32 1.0, %v675_v63  ;;  %v700_v6 = vsel %vm699_vm0, %v1325_v19, %v698_v51  ;;  %v729_v21 = vpop.permute.xlu1 %728  ;;  %v798_v51 = vld [vmem:[%s1296_s11 + $0x8] sm:$0xff]  ;;  %v803_v57 = vld [vmem:[%s1296_s11 + $0x30] sm:$0xff]  ;;  %v804_v63 = vld [vmem:[%s1296_s11 + $0x38] sm:$0xff] }
 0x12c   : > { %1128 = vpow2.f32 %v773_v62  ;;  %v661_v4 = vsel %vm659_vm11, %v660_v28, %v658_v1  ;;  %v686_v5 = vsel %vm685_vm14, %v1330_v22, %v684_v61  ;;  %v703_v11 = vsel %vm701_vm2, %v702_v59, %v700_v6  ;;  %v732_v22 = vpop.permute.xlu0 %731 }
 0x12d   : > { %1130 = vpow2.f32 %v781_v0  ;;  %v766_v7 = vsub.f32 1.0, %v661_v4  ;;  %v779_v8 = vmul.f32 1.442695, %v768_v2  ;;  %v689_v9 = vsel %vm687_vm15, %v688_v41, %v686_v5 }
 0x12e   : > { %v770_v10 = vsub.f32 1.0, %v689_v9  ;;  %v772_v18 = vsub.f32 1.0, %v703_v11  ;;  %vm754_vm4 = vcmp.lt.s32.totalorder %v705_v16, 8  ;;  %vm750_vm5 = vcmp.ne.s32.totalorder %v732_v22, %v999_v20 }
 0x12f   : > { %v775_v13 = vmul.f32 1.442695, %v766_v7  ;;  %1132 = vpow2.f32 %v779_v8  ;;  %vm759_vm6 = vmand %vm748_vm3, %vm754_vm4  ;;  %vm746_vm7 = vcmp.ne.s32.totalorder %v720_v60, %v999_v20  ;;  %vm747_vm9 = vcmp.ne.s32.totalorder %v723_v12, %v999_v20  ;;  %v735_v27 = vpop.permute.xlu1 %734 }
 0x130   : > { %v783_v17 = vmul.f32 1.442695, %v770_v10  ;;  %v787_v19 = vmul.f32 1.442695, %v772_v18  ;;  %vm761_vm8 = vmand %vm750_vm5, %vm754_vm4  ;;  %vm749_vm11 = vcmp.ne.s32.totalorder %v729_v21, %v999_v20  ;;  %v738_v29 = vpop.permute.xlu0 %737  ;;  %vm751_vm15 = vcmp.ne.s32.totalorder %v735_v27, %v999_v20 }
 0x131   : > { %1134 = vpow2.f32 %v775_v13  ;;  %vm757_vm10 = vmand %vm746_vm7, %vm754_vm4  ;;  %vm752_vm13 = vcmp.ne.s32.totalorder %v738_v29, %v999_v20 }
 0x132   : > { %1136 = vpow2.f32 %v785_v14  ;;  %vm758_vm12 = vmand %vm747_vm9, %vm754_vm4 }
 0x133   : > { %1138 = vpow2.f32 %v783_v17  ;;  %vm760_vm14 = vmand %vm749_vm11, %vm754_vm4  ;;  %v741_v37 = vpop.permute.xlu1 %740 }
 0x134   : > { %1140 = vpow2.f32 %v787_v19  ;;  %vm763_vm0 = vmand %vm752_vm13, %vm754_vm4  ;;  %vm753_vm3 = vcmp.ne.s32.totalorder %v741_v37, %v999_v20 }
 0x135   : > { %vm762_vm2 = vmand %vm751_vm15, %vm754_vm4 }
 0x136   : > { %vm764_vm5 = vmand %vm753_vm3, %vm754_vm4 }
 0x137   : > { %v1127_v24 = vpop.eup %1126 }
 0x138   : > { %v791_v23 = vsel %vm759_vm6, %v1127_v24, 0.0 }
 0x139   : > { %v1129_v25 = vpop.eup %1128  ;;  %809 = vadd.xlane.f32.xlu0 %v791_v23 }
 0x13a   : > { %v1131_v26 = vpop.eup %1130  ;;  %v789_v30 = vsel %vm757_vm10, %v1129_v25, 0.0 }
 0x13b   : > { %v793_v28 = vsel %vm761_vm8, %v1131_v26, 0.0 }
 0x13c   : > { %813 = vadd.xlane.f32.xlu1 %v793_v28  ;;  %v1133_v31 = vpop.eup %1132 }
 0x13d   : > { %805 = vadd.xlane.f32.xlu0 %v789_v30  ;;  %v792_v35 = vsel %vm760_vm14, %v1133_v31, 0.0 }
 0x13e   : > { %v1135_v32 = vpop.eup %1134 }
 0x13f   : > { %v790_v33 = vsel %vm758_vm12, %v1135_v32, 0.0  ;;  %v1137_v34 = vpop.eup %1136 }
 0x140   : > { %807 = vadd.xlane.f32.xlu1 %v790_v33  ;;  %v1139_v36 = vpop.eup %1138  ;;  %v795_v38 = vsel %vm763_vm0, %v1137_v34, 0.0 }
 0x141   : > { %811 = vadd.xlane.f32.xlu0 %v792_v35  ;;  %v794_v39 = vsel %vm762_vm2, %v1139_v36, 0.0  ;;  %v1141_v40 = vpop.eup %1140 }
 0x142   : > { %v796_v41 = vsel %vm764_vm5, %v1141_v40, 0.0 }
 0x144   : > { %817 = vadd.xlane.f32.xlu1 %v795_v38 }
 0x145   : > { %815 = vadd.xlane.f32.xlu0 %v794_v39 }
 0x149   : > { %819 = vadd.xlane.f32.xlu0 %v796_v41 }
 0x1c2   : > { %v810_v43 = vpop.xlane.xlu0 %809 }
 0x1c3   : > { %v823_v44 = vadd.f32 %v810_v43, %v799_v42 }
 0x1c5   : > { %832 = vst.msk [vmem:[%s1296_s11 + $0x10] sm:$0xff] %vm366_vm1, %v823_v44  ;;  %v814_v47 = vpop.xlane.xlu1 %813 }
 0x1c6   : > { %v825_v48 = vadd.f32 %v814_v47, %v801_v45  ;;  %v806_v49 = vpop.xlane.xlu0 %805 }
 0x1c7   : > { %v821_v50 = vadd.f32 %v806_v49, %v797_v46 }
 0x1c8   : > { %834 = vst.msk [vmem:[%s1296_s11 + $0x20] sm:$0xff] %vm366_vm1, %v825_v48 }
 0x1c9   : > { %830 = vst.msk [vmem:[%s1296_s11] sm:$0xff] %vm366_vm1, %v821_v50  ;;  %v808_v53 = vpop.xlane.xlu1 %807 }
 0x1ca   : > { %v822_v54 = vadd.f32 %v808_v53, %v798_v51  ;;  %v812_v55 = vpop.xlane.xlu0 %811 }
 0x1cb   : > { %v824_v56 = vadd.f32 %v812_v55, %v800_v52 }
 0x1cc   : > { %831 = vst.msk [vmem:[%s1296_s11 + $0x8] sm:$0xff] %vm366_vm1, %v822_v54 }
 0x1cd   : > { %833 = vst.msk [vmem:[%s1296_s11 + $0x18] sm:$0xff] %vm366_vm1, %v824_v56  ;;  %v818_v59 = vpop.xlane.xlu1 %817 }
 0x1ce   : > { %v827_v60 = vadd.f32 %v818_v59, %v803_v57  ;;  %v816_v61 = vpop.xlane.xlu0 %815 }
 0x1cf   : > { %v826_v62 = vadd.f32 %v816_v61, %v802_v58 }
 0x1d0   : > { %836 = vst.msk [vmem:[%s1296_s11 + $0x30] sm:$0xff] %vm366_vm1, %v827_v60 }
 0x1d1   : > { %835 = vst.msk [vmem:[%s1296_s11 + $0x28] sm:$0xff] %vm366_vm1, %v826_v62 }
 0x1d2   : > { %v820_v0 = vpop.xlane.xlu0 %819 }
 0x1d3   : > { %v828_v1 = vadd.f32 %v820_v0, %v804_v63 }
 0x1d5   : > { %837 = vst.msk [vmem:[%s1296_s11 + $0x38] sm:$0xff] %vm366_vm1, %v828_v1 }
 0x1d6 PF: > { %s16_s23 = sadd.s32 1, %s1164_s23   ;;  %s1443_s21 = smov %s1160_s22 }
 0x1d7   : > { %p13_p5 = scmp.ge.s32.totalorder %s16_s23, 4   ;;  %s1444_s22 = smov %s1446_s24 }
 0x1d9   :  { %15 = sbr.rel (!%p13_p5) target bundleno = 2 (0x2), region = 93 }

</bundles_post_ra>
